<compile_context>
chip_gen: v7x
topology: tpu7x:2x2x1
jax: 0.10.0
libtpu: 0.0.40
codegen_flags: <defaults>
</compile_context>

<pallas_src>
import jax
import jax.numpy as jnp
from jax.experimental import pallas as pl
from jax.experimental.pallas import tpu as pltpu

# ----------------------------- config (small synthetic sizes) -----------------------
B = 2               # batch
N_COLS = 4          # input channels
T = 16              # input_horizon (sequence length)
CNN_UNITS = [8, 8]  # cnn_units_list
K = 3               # kernel_size
DENSE = 32          # dense_units
OUT_H = 5           # output_horizon
N_FC = 1            # n_fc_layers


# ----------------------------- fused Pallas kernel ----------------------------------
def _make_fused_kernel(block_cfgs, fc_acts, b, t, maxpad, c_max, k):
    """block_cfgs: tuple of dicts {ci, co, dil, ds}; fc_acts: tuple of bools."""
    tp = t + maxpad  # per-batch padded segment length

    def kernel(*refs):
        # ---- unpack refs: inputs..., output, scratch ----
        idx = 0
        x_ref = refs[idx]; idx += 1
        blk_refs = []
        for cfg in block_cfgs:
            n = 6 if cfg["ds"] else 4
            blk_refs.append(refs[idx:idx + n]); idx += n
        fc_refs = []
        for _ in fc_acts:
            fc_refs.append(refs[idx:idx + 2]); idx += 2
        o_ref = refs[idx]; idx += 1
        act_a, act_b, col, flat = refs[idx:idx + 4]

        # One-time zeroing: pad columns of the activation buffers stay zero forever
        # (this IS the Chomp1d/causal padding); col's unused rows (when c_in < c_max)
        # are multiplied by zero-padded weight columns.
        act_a[...] = jnp.zeros(act_a.shape, act_a.dtype)
        act_b[...] = jnp.zeros(act_b.shape, act_b.dtype)
        col[...] = jnp.zeros(col.shape, col.dtype)

        def build_col(src, ci, dil):
            # im2col slab: row block j (tap j) holds src shifted by j*dil, batch folded
            # into lanes.  All offsets are static Python ints (fully unrolled).
            off = maxpad - (k - 1) * dil
            for j in range(k):
                s = off + j * dil
                for bb in range(b):
                    col[j * c_max:j * c_max + ci, bb * t:(bb + 1) * t] = (
                        src[0:ci, bb * tp + s:bb * tp + s + t])

        def stage(dst, val, co):
            # write (co, B*T) value into an activation buffer at per-batch offset maxpad
            for bb in range(b):
                dst[0:co, bb * tp + maxpad:(bb + 1) * tp] = val[:, bb * t:(bb + 1) * t]

        hbufs = (act_a, act_b)
        cur_src = x_ref
        out_val = None
        for i, cfg in enumerate(block_cfgs):
            ci, co, dil, has_ds = cfg["ci"], cfg["co"], cfg["dil"], cfg["ds"]
            if has_ds:
                w1, b1, w2, b2, wds, bds = blk_refs[i]
            else:
                w1, b1, w2, b2 = blk_refs[i]

            # --- conv1 (causal dilated) as a single im2col matmul + relu ---
            build_col(cur_src, ci, dil)
            # tap (k-1) of the slab IS the unpadded block input -> reuse it for residual
            xu = col[(k - 1) * c_max:(k - 1) * c_max + ci, :]
            h = jnp.maximum(
                jnp.dot(w1[...], col[...], preferred_element_type=jnp.float32)
                + b1[...], 0.0)

            hbuf = hbufs[i % 2]
            stage(hbuf, h, co)

            # --- conv2 over the (causally re-padded) hidden activations ---
            build_col(hbuf, co, dil)
            out2 = jnp.maximum(
                jnp.dot(w2[...], col[...], preferred_element_type=jnp.float32)
                + b2[...], 0.0)

            # --- residual: skip matmul entirely when the 1x1 conv would be identity ---
            if has_ds:
                res = jnp.dot(wds[...], xu, preferred_element_type=jnp.float32) + bds[...]
            else:
                res = xu
            out_val = jnp.maximum(out2 + res, 0.0)          # (co, B*T)

            if i < len(block_cfgs) - 1:
                stage(hbuf, out_val, co)                    # becomes next block's input
                cur_src = hbuf

        # --- flatten to (B, C_last*T) exactly like torch .view(B, -1) on (B, C, T) ---
        c_last = block_cfgs[-1]["co"]
        for bb in range(b):
            for c in range(c_last):
                flat[bb:bb + 1, c * t:(c + 1) * t] = out_val[c:c + 1, bb * t:(bb + 1) * t]

        # --- FC head, all in VMEM; only the final result is written out ---
        hfc = flat[...]
        for li, act in enumerate(fc_acts):
            w_ref, bias_ref = fc_refs[li]
            hfc = jnp.dot(hfc, w_ref[...], preferred_element_type=jnp.float32) + bias_ref[...]
            if act:
                hfc = jnp.maximum(hfc, 0.0)
        o_ref[...] = hfc

    return kernel


def _flatten_conv_w(w, c_max):
    # (c_out, c_in, K) -> (c_out, K*c_max): column j*c_max + c holds w[:, c, j],
    # zero-padded for c >= c_in.  Pure wrapper-side layout plumbing.
    co, ci, k = w.shape
    wt = jnp.transpose(w, (0, 2, 1))                      # (co, K, ci)
    if ci < c_max:
        wt = jnp.pad(wt, ((0, 0), (0, 0), (0, c_max - ci)))
    return wt.reshape(co, k * c_max)


def tcn_forward(x, params):
    b, c_in, t = x.shape
    c_max = max(max(p["w1"].shape[0], p["w1"].shape[1]) for p in params["blocks"])
    maxpad = max((K - 1) * int(p["dil"]) for p in params["blocks"])
    tp = t + maxpad

    # input -> (C_in, B*(T+maxpad)): per-batch segments with `maxpad` zero columns of
    # causal left padding (Conv1d(padding=p) followed by Chomp1d(p)).
    xt = jnp.pad(jnp.transpose(x, (1, 0, 2)), ((0, 0), (0, 0), (maxpad, 0)))
    x_arr = xt.reshape(c_in, b * tp)

    block_cfgs = []
    args = [x_arr]
    for p in params["blocks"]:
        co, ci, _ = p["w1"].shape
        has_ds = (ci != co)
        block_cfgs.append({"ci": ci, "co": co, "dil": int(p["dil"]), "ds": has_ds})
        args += [_flatten_conv_w(p["w1"], c_max), p["b1"].reshape(-1, 1),
                 _flatten_conv_w(p["w2"], c_max), p["b2"].reshape(-1, 1)]
        if has_ds:
            args += [p["wds"], p["bds"].reshape(-1, 1)]

    fc_acts = []
    for layer in params["fc"]:
        fc_acts.append(bool(layer["act"]))
        args += [layer["w"], layer["b"].reshape(1, -1)]

    c_last = block_cfgs[-1]["co"]
    out_h = params["fc"][-1]["w"].shape[1]

    kernel = _make_fused_kernel(tuple(block_cfgs), tuple(fc_acts),
                                b, t, maxpad, c_max, K)
    out = pl.pallas_call(
        kernel,
        out_shape=jax.ShapeDtypeStruct((b, out_h), jnp.float32),
        scratch_shapes=[
            pltpu.VMEM((c_max, b * tp), jnp.float32),       # activation ping
            pltpu.VMEM((c_max, b * tp), jnp.float32),       # activation pong
            pltpu.VMEM((K * c_max, b * t), jnp.float32),    # im2col slab
            pltpu.VMEM((b, c_last * t), jnp.float32),       # flattened features
        ],
    )(*args)
    return out.reshape(b, 1, out_h)


# ----------------------------- parameters (deterministic, synthetic) ----------------
def weight_norm_effective(v, g):
    # PyTorch weight_norm default dim=0: per-output-channel norm over (C_in, K)
    n = jnp.sqrt(jnp.sum(v * v, axis=(1, 2), keepdims=True))
    return (g.reshape(-1, 1, 1) / n) * v


def init_params(key):
    params = {"blocks": [], "fc": []}
    c_prev = N_COLS
    for i, c_out in enumerate(CNN_UNITS):
        keys = jax.random.split(key, 8)
        key = keys[0]
        v1 = 0.01 * jax.random.normal(keys[1], (c_out, c_prev, K), jnp.float32)
        g1 = jnp.sqrt(jnp.sum(v1 * v1, axis=(1, 2))) * (
            1.0 + 0.1 * jax.random.normal(keys[2], (c_out,), jnp.float32))
        b1 = 0.05 * jax.random.normal(keys[3], (c_out,), jnp.float32)
        v2 = 0.01 * jax.random.normal(keys[4], (c_out, c_out, K), jnp.float32)
        g2 = jnp.sqrt(jnp.sum(v2 * v2, axis=(1, 2))) * (
            1.0 + 0.1 * jax.random.normal(keys[5], (c_out,), jnp.float32))
        b2 = 0.05 * jax.random.normal(keys[6], (c_out,), jnp.float32)
        if c_prev != c_out:
            wds = 0.01 * jax.random.normal(keys[7], (c_out, c_prev), jnp.float32)
            bds = 0.05 * jax.random.normal(jax.random.fold_in(keys[7], 1),
                                           (c_out,), jnp.float32)
        else:
            wds = jnp.eye(c_out, dtype=jnp.float32)   # identity residual (ref only)
            bds = jnp.zeros((c_out,), jnp.float32)
        params["blocks"].append({
            "w1": weight_norm_effective(v1, g1), "b1": b1,
            "w2": weight_norm_effective(v2, g2), "b2": b2,
            "wds": wds, "bds": bds, "dil": 2 ** i,
        })
        c_prev = c_out

    # fully-connected head
    if N_FC == 0:
        dims = [CNN_UNITS[-1] * T, OUT_H]
    else:
        dims = [CNN_UNITS[-1] * T] + [DENSE] * N_FC + [OUT_H]
    fc = []
    for li in range(len(dims) - 1):
        kk = jax.random.fold_in(key, 100 + li)
        kw, kb = jax.random.split(kk)
        fin, fout = dims[li], dims[li + 1]
        w = jax.random.normal(kw, (fin, fout), jnp.float32) / jnp.sqrt(float(fin))
        b = 0.05 * jax.random.normal(kb, (fout,), jnp.float32)
        act = (N_FC > 0) and (li < len(dims) - 2)
        fc.append({"w": w, "b": b, "act": act})
    params["fc"] = fc
    return params


# ----------------------------- pure-JAX reference (for correctness check) -----------
def conv1d_causal_ref(x, w, b, dil, pad):
    y = jax.lax.conv_general_dilated(
        x, w, window_strides=(1,), padding=[(pad, pad)], rhs_dilation=(dil,),
        dimension_numbers=("NCH", "OIH", "NCH"))
    y = y + b.reshape(1, -1, 1)
    return y[:, :, : x.shape[2]]   # Chomp1d(pad)


def tcn_ref(x, params):
    h = x
    for p in params["blocks"]:
        dil = p["dil"]
        pad = (K - 1) * dil
        a = jax.nn.relu(conv1d_causal_ref(h, p["w1"], p["b1"], dil, pad))
        a = jax.nn.relu(conv1d_causal_ref(a, p["w2"], p["b2"], dil, pad))
        res = jnp.einsum("oc,bct->bot", p["wds"], h) + p["bds"].reshape(1, -1, 1)
        h = jax.nn.relu(a + res)
    h = h.reshape(h.shape[0], -1)
    for layer in params["fc"]:
        h = h @ layer["w"] + layer["b"].reshape(1, -1)
        if layer["act"]:
            h = jax.nn.relu(h)
    return h.reshape(-1, 1, h.shape[-1])


# ----------------------------- main --------------------------------------------------
if __name__ == "__main__":
    key = jax.random.PRNGKey(0)
    kx, kp = jax.random.split(key)
    x = jax.random.normal(kx, (B, N_COLS, T), jnp.float32)
    params = init_params(kp)

    out = jax.block_until_ready(tcn_forward(x, params))
    ref = jax.block_until_ready(tcn_ref(x, params))

    assert out.shape == (B, 1, OUT_H), out.shape
    assert jnp.allclose(out, ref, atol=1e-4, rtol=1e-4), (out, ref)
    print("KERNEL_OK")
</pallas_src>

<mosaic_0001>
module attributes {stable_mosaic.version = 11 : i64} {
  func.func @kernel(%arg0: memref<4x40xf32, #tpu.memory_space<vmem>>, %arg1: memref<8x24xf32, #tpu.memory_space<vmem>>, %arg2: memref<8x1xf32, #tpu.memory_space<vmem>>, %arg3: memref<8x24xf32, #tpu.memory_space<vmem>>, %arg4: memref<8x1xf32, #tpu.memory_space<vmem>>, %arg5: memref<8x4xf32, #tpu.memory_space<vmem>>, %arg6: memref<8x1xf32, #tpu.memory_space<vmem>>, %arg7: memref<8x24xf32, #tpu.memory_space<vmem>>, %arg8: memref<8x1xf32, #tpu.memory_space<vmem>>, %arg9: memref<8x24xf32, #tpu.memory_space<vmem>>, %arg10: memref<8x1xf32, #tpu.memory_space<vmem>>, %arg11: memref<128x32xf32, #tpu.memory_space<vmem>>, %arg12: memref<1x32xf32, #tpu.memory_space<vmem>>, %arg13: memref<32x5xf32, #tpu.memory_space<vmem>>, %arg14: memref<1x5xf32, #tpu.memory_space<vmem>>, %arg15: memref<2x5xf32, #tpu.memory_space<vmem>>, %arg16: memref<8x40xf32, #tpu.memory_space<vmem>>, %arg17: memref<8x40xf32, #tpu.memory_space<vmem>>, %arg18: memref<24x32xf32, #tpu.memory_space<vmem>>, %arg19: memref<2x128xf32, #tpu.memory_space<vmem>>) attributes {dimension_semantics = [], scalar_prefetch = 0 : i64, scratch_operands = 4 : i64, tpu.core_type = #tpu.core_type<tc>} {
    %cst = arith.constant 0.000000e+00 : f32
    %0 = vector.broadcast %cst : f32 to vector<8x40xf32>
    %c0 = arith.constant 0 : index
    %c0_0 = arith.constant 0 : index
    %1 = vector.load %arg16[%c0, %c0_0] : memref<8x40xf32, #tpu.memory_space<vmem>>, vector<8x40xf32>
    tpu.vector_store %arg16[%c0, %c0_0], %0 {strides = array<i32>} : memref<8x40xf32, #tpu.memory_space<vmem>>, vector<8x40xf32>,
    %cst_1 = arith.constant 0.000000e+00 : f32
    %2 = vector.broadcast %cst_1 : f32 to vector<8x40xf32>
    %c0_2 = arith.constant 0 : index
    %c0_3 = arith.constant 0 : index
    %3 = vector.load %arg17[%c0_2, %c0_3] : memref<8x40xf32, #tpu.memory_space<vmem>>, vector<8x40xf32>
    tpu.vector_store %arg17[%c0_2, %c0_3], %2 {strides = array<i32>} : memref<8x40xf32, #tpu.memory_space<vmem>>, vector<8x40xf32>,
    %cst_4 = arith.constant 0.000000e+00 : f32
    %4 = vector.broadcast %cst_4 : f32 to vector<24x32xf32>
    %c0_5 = arith.constant 0 : index
    %c0_6 = arith.constant 0 : index
    %5 = vector.load %arg18[%c0_5, %c0_6] : memref<24x32xf32, #tpu.memory_space<vmem>>, vector<24x32xf32>
    tpu.vector_store %arg18[%c0_5, %c0_6], %4 {strides = array<i32>} : memref<24x32xf32, #tpu.memory_space<vmem>>, vector<24x32xf32>,
    %c0_7 = arith.constant 0 : index
    %c2 = arith.constant 2 : index
    %6 = vector.load %arg0[%c0_7, %c2] : memref<4x40xf32, #tpu.memory_space<vmem>>, vector<4x16xf32>
    %c0_8 = arith.constant 0 : index
    %c0_9 = arith.constant 0 : index
    %7 = vector.load %arg18[%c0_8, %c0_9] : memref<24x32xf32, #tpu.memory_space<vmem>>, vector<4x16xf32>
    tpu.vector_store %arg18[%c0_8, %c0_9], %6 {strides = array<i32>} : memref<24x32xf32, #tpu.memory_space<vmem>>, vector<4x16xf32>,
    %c0_10 = arith.constant 0 : index
    %c22 = arith.constant 22 : index
    %8 = vector.load %arg0[%c0_10, %c22] : memref<4x40xf32, #tpu.memory_space<vmem>>, vector<4x16xf32>
    %c0_11 = arith.constant 0 : index
    %c16 = arith.constant 16 : index
    %9 = vector.load %arg18[%c0_11, %c16] : memref<24x32xf32, #tpu.memory_space<vmem>>, vector<4x16xf32>
    tpu.vector_store %arg18[%c0_11, %c16], %8 {strides = array<i32>} : memref<24x32xf32, #tpu.memory_space<vmem>>, vector<4x16xf32>,
    %c0_12 = arith.constant 0 : index
    %c3 = arith.constant 3 : index
    %10 = vector.load %arg0[%c0_12, %c3] : memref<4x40xf32, #tpu.memory_space<vmem>>, vector<4x16xf32>
    %c8 = arith.constant 8 : index
    %c0_13 = arith.constant 0 : index
    %11 = vector.load %arg18[%c8, %c0_13] : memref<24x32xf32, #tpu.memory_space<vmem>>, vector<4x16xf32>
    tpu.vector_store %arg18[%c8, %c0_13], %10 {strides = array<i32>} : memref<24x32xf32, #tpu.memory_space<vmem>>, vector<4x16xf32>,
    %c0_14 = arith.constant 0 : index
    %c23 = arith.constant 23 : index
    %12 = vector.load %arg0[%c0_14, %c23] : memref<4x40xf32, #tpu.memory_space<vmem>>, vector<4x16xf32>
    %c8_15 = arith.constant 8 : index
    %c16_16 = arith.constant 16 : index
    %13 = vector.load %arg18[%c8_15, %c16_16] : memref<24x32xf32, #tpu.memory_space<vmem>>, vector<4x16xf32>
    tpu.vector_store %arg18[%c8_15, %c16_16], %12 {strides = array<i32>} : memref<24x32xf32, #tpu.memory_space<vmem>>, vector<4x16xf32>,
    %c0_17 = arith.constant 0 : index
    %c4 = arith.constant 4 : index
    %14 = vector.load %arg0[%c0_17, %c4] : memref<4x40xf32, #tpu.memory_space<vmem>>, vector<4x16xf32>
    %c16_18 = arith.constant 16 : index
    %c0_19 = arith.constant 0 : index
    %15 = vector.load %arg18[%c16_18, %c0_19] : memref<24x32xf32, #tpu.memory_space<vmem>>, vector<4x16xf32>
    tpu.vector_store %arg18[%c16_18, %c0_19], %14 {strides = array<i32>} : memref<24x32xf32, #tpu.memory_space<vmem>>, vector<4x16xf32>,
    %c0_20 = arith.constant 0 : index
    %c24 = arith.constant 24 : index
    %16 = vector.load %arg0[%c0_20, %c24] : memref<4x40xf32, #tpu.memory_space<vmem>>, vector<4x16xf32>
    %c16_21 = arith.constant 16 : index
    %c16_22 = arith.constant 16 : index
    %17 = vector.load %arg18[%c16_21, %c16_22] : memref<24x32xf32, #tpu.memory_space<vmem>>, vector<4x16xf32>
    tpu.vector_store %arg18[%c16_21, %c16_22], %16 {strides = array<i32>} : memref<24x32xf32, #tpu.memory_space<vmem>>, vector<4x16xf32>,
    %c16_23 = arith.constant 16 : index
    %c0_24 = arith.constant 0 : index
    %18 = vector.load %arg18[%c16_23, %c0_24] : memref<24x32xf32, #tpu.memory_space<vmem>>, vector<4x32xf32>
    %c0_25 = arith.constant 0 : index
    %c0_26 = arith.constant 0 : index
    %19 = vector.load %arg1[%c0_25, %c0_26] : memref<8x24xf32, #tpu.memory_space<vmem>>, vector<8x24xf32>
    %c0_27 = arith.constant 0 : index
    %c0_28 = arith.constant 0 : index
    %20 = vector.load %arg18[%c0_27, %c0_28] : memref<24x32xf32, #tpu.memory_space<vmem>>, vector<24x32xf32>
    %cst_29 = arith.constant dense<0.000000e+00> : vector<8x32xf32>
    %21 = tpu.matmul %19, %20, %cst_29 {dimension_numbers = #tpu.dot_dimension_numbers<[1], [0], [0], [1], [0, 0, 1, 1], [], []>} : vector<8x24xf32>, vector<24x32xf32>, vector<8x32xf32> -> vector<8x32xf32>
    %c0_30 = arith.constant 0 : index
    %c0_31 = arith.constant 0 : index
    %22 = vector.load %arg2[%c0_30, %c0_31] : memref<8x1xf32, #tpu.memory_space<vmem>>, vector<8x1xf32>
    %23 = vector.broadcast %22 : vector<8x1xf32> to vector<8x32xf32>
    %24 = arith.addf %21, %23 : vector<8x32xf32>
    %cst_32 = arith.constant 0.000000e+00 : f32
    %25 = vector.broadcast %cst_32 : f32 to vector<8x32xf32>
    %26 = arith.maximumf %24, %25 : vector<8x32xf32>
    %27 = vector.extract_strided_slice %26 {offsets = [0, 0], sizes = [8, 16], strides = [1, 1]} : vector<8x32xf32> to vector<8x16xf32>
    %c0_33 = arith.constant 0 : index
    %c4_34 = arith.constant 4 : index
    %28 = vector.load %arg16[%c0_33, %c4_34] : memref<8x40xf32, #tpu.memory_space<vmem>>, vector<8x16xf32>
    tpu.vector_store %arg16[%c0_33, %c4_34], %27 {strides = array<i32>} : memref<8x40xf32, #tpu.memory_space<vmem>>, vector<8x16xf32>,
    %29 = vector.extract_strided_slice %26 {offsets = [0, 16], sizes = [8, 16], strides = [1, 1]} : vector<8x32xf32> to vector<8x16xf32>
    %c0_35 = arith.constant 0 : index
    %c24_36 = arith.constant 24 : index
    %30 = vector.load %arg16[%c0_35, %c24_36] : memref<8x40xf32, #tpu.memory_space<vmem>>, vector<8x16xf32>
    tpu.vector_store %arg16[%c0_35, %c24_36], %29 {strides = array<i32>} : memref<8x40xf32, #tpu.memory_space<vmem>>, vector<8x16xf32>,
    %c0_37 = arith.constant 0 : index
    %c2_38 = arith.constant 2 : index
    %31 = vector.load %arg16[%c0_37, %c2_38] : memref<8x40xf32, #tpu.memory_space<vmem>>, vector<8x16xf32>
    %c0_39 = arith.constant 0 : index
    %c0_40 = arith.constant 0 : index
    %32 = vector.load %arg18[%c0_39, %c0_40] : memref<24x32xf32, #tpu.memory_space<vmem>>, vector<8x16xf32>
    tpu.vector_store %arg18[%c0_39, %c0_40], %31 {strides = array<i32>} : memref<24x32xf32, #tpu.memory_space<vmem>>, vector<8x16xf32>,
    %c0_41 = arith.constant 0 : index
    %c22_42 = arith.constant 22 : index
    %33 = vector.load %arg16[%c0_41, %c22_42] : memref<8x40xf32, #tpu.memory_space<vmem>>, vector<8x16xf32>
    %c0_43 = arith.constant 0 : index
    %c16_44 = arith.constant 16 : index
    %34 = vector.load %arg18[%c0_43, %c16_44] : memref<24x32xf32, #tpu.memory_space<vmem>>, vector<8x16xf32>
    tpu.vector_store %arg18[%c0_43, %c16_44], %33 {strides = array<i32>} : memref<24x32xf32, #tpu.memory_space<vmem>>, vector<8x16xf32>,
    %c0_45 = arith.constant 0 : index
    %c3_46 = arith.constant 3 : index
    %35 = vector.load %arg16[%c0_45, %c3_46] : memref<8x40xf32, #tpu.memory_space<vmem>>, vector<8x16xf32>
    %c8_47 = arith.constant 8 : index
    %c0_48 = arith.constant 0 : index
    %36 = vector.load %arg18[%c8_47, %c0_48] : memref<24x32xf32, #tpu.memory_space<vmem>>, vector<8x16xf32>
    tpu.vector_store %arg18[%c8_47, %c0_48], %35 {strides = array<i32>} : memref<24x32xf32, #tpu.memory_space<vmem>>, vector<8x16xf32>,
    %c0_49 = arith.constant 0 : index
    %c23_50 = arith.constant 23 : index
    %37 = vector.load %arg16[%c0_49, %c23_50] : memref<8x40xf32, #tpu.memory_space<vmem>>, vector<8x16xf32>
    %c8_51 = arith.constant 8 : index
    %c16_52 = arith.constant 16 : index
    %38 = vector.load %arg18[%c8_51, %c16_52] : memref<24x32xf32, #tpu.memory_space<vmem>>, vector<8x16xf32>
    tpu.vector_store %arg18[%c8_51, %c16_52], %37 {strides = array<i32>} : memref<24x32xf32, #tpu.memory_space<vmem>>, vector<8x16xf32>,
    %c0_53 = arith.constant 0 : index
    %c4_54 = arith.constant 4 : index
    %39 = vector.load %arg16[%c0_53, %c4_54] : memref<8x40xf32, #tpu.memory_space<vmem>>, vector<8x16xf32>
    %c16_55 = arith.constant 16 : index
    %c0_56 = arith.constant 0 : index
    %40 = vector.load %arg18[%c16_55, %c0_56] : memref<24x32xf32, #tpu.memory_space<vmem>>, vector<8x16xf32>
    tpu.vector_store %arg18[%c16_55, %c0_56], %39 {strides = array<i32>} : memref<24x32xf32, #tpu.memory_space<vmem>>, vector<8x16xf32>,
    %c0_57 = arith.constant 0 : index
    %c24_58 = arith.constant 24 : index
    %41 = vector.load %arg16[%c0_57, %c24_58] : memref<8x40xf32, #tpu.memory_space<vmem>>, vector<8x16xf32>
    %c16_59 = arith.constant 16 : index
    %c16_60 = arith.constant 16 : index
    %42 = vector.load %arg18[%c16_59, %c16_60] : memref<24x32xf32, #tpu.memory_space<vmem>>, vector<8x16xf32>
    tpu.vector_store %arg18[%c16_59, %c16_60], %41 {strides = array<i32>} : memref<24x32xf32, #tpu.memory_space<vmem>>, vector<8x16xf32>,
    %c0_61 = arith.constant 0 : index
    %c0_62 = arith.constant 0 : index
    %43 = vector.load %arg3[%c0_61, %c0_62] : memref<8x24xf32, #tpu.memory_space<vmem>>, vector<8x24xf32>
    %c0_63 = arith.constant 0 : index
    %c0_64 = arith.constant 0 : index
    %44 = vector.load %arg18[%c0_63, %c0_64] : memref<24x32xf32, #tpu.memory_space<vmem>>, vector<24x32xf32>
    %cst_65 = arith.constant dense<0.000000e+00> : vector<8x32xf32>
    %45 = tpu.matmul %43, %44, %cst_65 {dimension_numbers = #tpu.dot_dimension_numbers<[1], [0], [0], [1], [0, 0, 1, 1], [], []>} : vector<8x24xf32>, vector<24x32xf32>, vector<8x32xf32> -> vector<8x32xf32>
    %c0_66 = arith.constant 0 : index
    %c0_67 = arith.constant 0 : index
    %46 = vector.load %arg4[%c0_66, %c0_67] : memref<8x1xf32, #tpu.memory_space<vmem>>, vector<8x1xf32>
    %47 = vector.broadcast %46 : vector<8x1xf32> to vector<8x32xf32>
    %48 = arith.addf %45, %47 : vector<8x32xf32>
    %cst_68 = arith.constant 0.000000e+00 : f32
    %49 = vector.broadcast %cst_68 : f32 to vector<8x32xf32>
    %50 = arith.maximumf %48, %49 : vector<8x32xf32>
    %c0_69 = arith.constant 0 : index
    %c0_70 = arith.constant 0 : index
    %51 = vector.load %arg5[%c0_69, %c0_70] : memref<8x4xf32, #tpu.memory_space<vmem>>, vector<8x4xf32>
    %cst_71 = arith.constant dense<0.000000e+00> : vector<8x32xf32>
    %52 = tpu.matmul %51, %18, %cst_71 {dimension_numbers = #tpu.dot_dimension_numbers<[1], [0], [0], [1], [0, 0, 1, 1], [], []>} : vector<8x4xf32>, vector<4x32xf32>, vector<8x32xf32> -> vector<8x32xf32>
    %c0_72 = arith.constant 0 : index
    %c0_73 = arith.constant 0 : index
    %53 = vector.load %arg6[%c0_72, %c0_73] : memref<8x1xf32, #tpu.memory_space<vmem>>, vector<8x1xf32>
    %54 = vector.broadcast %53 : vector<8x1xf32> to vector<8x32xf32>
    %55 = arith.addf %52, %54 : vector<8x32xf32>
    %56 = arith.addf %50, %55 : vector<8x32xf32>
    %cst_74 = arith.constant 0.000000e+00 : f32
    %57 = vector.broadcast %cst_74 : f32 to vector<8x32xf32>
    %58 = arith.maximumf %56, %57 : vector<8x32xf32>
    %59 = vector.extract_strided_slice %58 {offsets = [0, 0], sizes = [8, 16], strides = [1, 1]} : vector<8x32xf32> to vector<8x16xf32>
    %c0_75 = arith.constant 0 : index
    %c4_76 = arith.constant 4 : index
    %60 = vector.load %arg16[%c0_75, %c4_76] : memref<8x40xf32, #tpu.memory_space<vmem>>, vector<8x16xf32>
    tpu.vector_store %arg16[%c0_75, %c4_76], %59 {strides = array<i32>} : memref<8x40xf32, #tpu.memory_space<vmem>>, vector<8x16xf32>,
    %61 = vector.extract_strided_slice %58 {offsets = [0, 16], sizes = [8, 16], strides = [1, 1]} : vector<8x32xf32> to vector<8x16xf32>
    %c0_77 = arith.constant 0 : index
    %c24_78 = arith.constant 24 : index
    %62 = vector.load %arg16[%c0_77, %c24_78] : memref<8x40xf32, #tpu.memory_space<vmem>>, vector<8x16xf32>
    tpu.vector_store %arg16[%c0_77, %c24_78], %61 {strides = array<i32>} : memref<8x40xf32, #tpu.memory_space<vmem>>, vector<8x16xf32>,
    %c0_79 = arith.constant 0 : index
    %c0_80 = arith.constant 0 : index
    %63 = vector.load %arg16[%c0_79, %c0_80] : memref<8x40xf32, #tpu.memory_space<vmem>>, vector<8x16xf32>
    %c0_81 = arith.constant 0 : index
    %c0_82 = arith.constant 0 : index
    %64 = vector.load %arg18[%c0_81, %c0_82] : memref<24x32xf32, #tpu.memory_space<vmem>>, vector<8x16xf32>
    tpu.vector_store %arg18[%c0_81, %c0_82], %63 {strides = array<i32>} : memref<24x32xf32, #tpu.memory_space<vmem>>, vector<8x16xf32>,
    %c0_83 = arith.constant 0 : index
    %c20 = arith.constant 20 : index
    %65 = vector.load %arg16[%c0_83, %c20] : memref<8x40xf32, #tpu.memory_space<vmem>>, vector<8x16xf32>
    %c0_84 = arith.constant 0 : index
    %c16_85 = arith.constant 16 : index
    %66 = vector.load %arg18[%c0_84, %c16_85] : memref<24x32xf32, #tpu.memory_space<vmem>>, vector<8x16xf32>
    tpu.vector_store %arg18[%c0_84, %c16_85], %65 {strides = array<i32>} : memref<24x32xf32, #tpu.memory_space<vmem>>, vector<8x16xf32>,
    %c0_86 = arith.constant 0 : index
    %c2_87 = arith.constant 2 : index
    %67 = vector.load %arg16[%c0_86, %c2_87] : memref<8x40xf32, #tpu.memory_space<vmem>>, vector<8x16xf32>
    %c8_88 = arith.constant 8 : index
    %c0_89 = arith.constant 0 : index
    %68 = vector.load %arg18[%c8_88, %c0_89] : memref<24x32xf32, #tpu.memory_space<vmem>>, vector<8x16xf32>
    tpu.vector_store %arg18[%c8_88, %c0_89], %67 {strides = array<i32>} : memref<24x32xf32, #tpu.memory_space<vmem>>, vector<8x16xf32>,
    %c0_90 = arith.constant 0 : index
    %c22_91 = arith.constant 22 : index
    %69 = vector.load %arg16[%c0_90, %c22_91] : memref<8x40xf32, #tpu.memory_space<vmem>>, vector<8x16xf32>
    %c8_92 = arith.constant 8 : index
    %c16_93 = arith.constant 16 : index
    %70 = vector.load %arg18[%c8_92, %c16_93] : memref<24x32xf32, #tpu.memory_space<vmem>>, vector<8x16xf32>
    tpu.vector_store %arg18[%c8_92, %c16_93], %69 {strides = array<i32>} : memref<24x32xf32, #tpu.memory_space<vmem>>, vector<8x16xf32>,
    %c0_94 = arith.constant 0 : index
    %c4_95 = arith.constant 4 : index
    %71 = vector.load %arg16[%c0_94, %c4_95] : memref<8x40xf32, #tpu.memory_space<vmem>>, vector<8x16xf32>
    %c16_96 = arith.constant 16 : index
    %c0_97 = arith.constant 0 : index
    %72 = vector.load %arg18[%c16_96, %c0_97] : memref<24x32xf32, #tpu.memory_space<vmem>>, vector<8x16xf32>
    tpu.vector_store %arg18[%c16_96, %c0_97], %71 {strides = array<i32>} : memref<24x32xf32, #tpu.memory_space<vmem>>, vector<8x16xf32>,
    %c0_98 = arith.constant 0 : index
    %c24_99 = arith.constant 24 : index
    %73 = vector.load %arg16[%c0_98, %c24_99] : memref<8x40xf32, #tpu.memory_space<vmem>>, vector<8x16xf32>
    %c16_100 = arith.constant 16 : index
    %c16_101 = arith.constant 16 : index
    %74 = vector.load %arg18[%c16_100, %c16_101] : memref<24x32xf32, #tpu.memory_space<vmem>>, vector<8x16xf32>
    tpu.vector_store %arg18[%c16_100, %c16_101], %73 {strides = array<i32>} : memref<24x32xf32, #tpu.memory_space<vmem>>, vector<8x16xf32>,
    %c16_102 = arith.constant 16 : index
    %c0_103 = arith.constant 0 : index
    %75 = vector.load %arg18[%c16_102, %c0_103] : memref<24x32xf32, #tpu.memory_space<vmem>>, vector<8x32xf32>
    %c0_104 = arith.constant 0 : index
    %c0_105 = arith.constant 0 : index
    %76 = vector.load %arg7[%c0_104, %c0_105] : memref<8x24xf32, #tpu.memory_space<vmem>>, vector<8x24xf32>
    %c0_106 = arith.constant 0 : index
    %c0_107 = arith.constant 0 : index
    %77 = vector.load %arg18[%c0_106, %c0_107] : memref<24x32xf32, #tpu.memory_space<vmem>>, vector<24x32xf32>
    %cst_108 = arith.constant dense<0.000000e+00> : vector<8x32xf32>
    %78 = tpu.matmul %76, %77, %cst_108 {dimension_numbers = #tpu.dot_dimension_numbers<[1], [0], [0], [1], [0, 0, 1, 1], [], []>} : vector<8x24xf32>, vector<24x32xf32>, vector<8x32xf32> -> vector<8x32xf32>
    %c0_109 = arith.constant 0 : index
    %c0_110 = arith.constant 0 : index
    %79 = vector.load %arg8[%c0_109, %c0_110] : memref<8x1xf32, #tpu.memory_space<vmem>>, vector<8x1xf32>
    %80 = vector.broadcast %79 : vector<8x1xf32> to vector<8x32xf32>
    %81 = arith.addf %78, %80 : vector<8x32xf32>
    %cst_111 = arith.constant 0.000000e+00 : f32
    %82 = vector.broadcast %cst_111 : f32 to vector<8x32xf32>
    %83 = arith.maximumf %81, %82 : vector<8x32xf32>
    %84 = vector.extract_strided_slice %83 {offsets = [0, 0], sizes = [8, 16], strides = [1, 1]} : vector<8x32xf32> to vector<8x16xf32>
    %c0_112 = arith.constant 0 : index
    %c4_113 = arith.constant 4 : index
    %85 = vector.load %arg17[%c0_112, %c4_113] : memref<8x40xf32, #tpu.memory_space<vmem>>, vector<8x16xf32>
    tpu.vector_store %arg17[%c0_112, %c4_113], %84 {strides = array<i32>} : memref<8x40xf32, #tpu.memory_space<vmem>>, vector<8x16xf32>,
    %86 = vector.extract_strided_slice %83 {offsets = [0, 16], sizes = [8, 16], strides = [1, 1]} : vector<8x32xf32> to vector<8x16xf32>
    %c0_114 = arith.constant 0 : index
    %c24_115 = arith.constant 24 : index
    %87 = vector.load %arg17[%c0_114, %c24_115] : memref<8x40xf32, #tpu.memory_space<vmem>>, vector<8x16xf32>
    tpu.vector_store %arg17[%c0_114, %c24_115], %86 {strides = array<i32>} : memref<8x40xf32, #tpu.memory_space<vmem>>, vector<8x16xf32>,
    %c0_116 = arith.constant 0 : index
    %c0_117 = arith.constant 0 : index
    %88 = vector.load %arg17[%c0_116, %c0_117] : memref<8x40xf32, #tpu.memory_space<vmem>>, vector<8x16xf32>
    %c0_118 = arith.constant 0 : index
    %c0_119 = arith.constant 0 : index
    %89 = vector.load %arg18[%c0_118, %c0_119] : memref<24x32xf32, #tpu.memory_space<vmem>>, vector<8x16xf32>
    tpu.vector_store %arg18[%c0_118, %c0_119], %88 {strides = array<i32>} : memref<24x32xf32, #tpu.memory_space<vmem>>, vector<8x16xf32>,
    %c0_120 = arith.constant 0 : index
    %c20_121 = arith.constant 20 : index
    %90 = vector.load %arg17[%c0_120, %c20_121] : memref<8x40xf32, #tpu.memory_space<vmem>>, vector<8x16xf32>
    %c0_122 = arith.constant 0 : index
    %c16_123 = arith.constant 16 : index
    %91 = vector.load %arg18[%c0_122, %c16_123] : memref<24x32xf32, #tpu.memory_space<vmem>>, vector<8x16xf32>
    tpu.vector_store %arg18[%c0_122, %c16_123], %90 {strides = array<i32>} : memref<24x32xf32, #tpu.memory_space<vmem>>, vector<8x16xf32>,
    %c0_124 = arith.constant 0 : index
    %c2_125 = arith.constant 2 : index
    %92 = vector.load %arg17[%c0_124, %c2_125] : memref<8x40xf32, #tpu.memory_space<vmem>>, vector<8x16xf32>
    %c8_126 = arith.constant 8 : index
    %c0_127 = arith.constant 0 : index
    %93 = vector.load %arg18[%c8_126, %c0_127] : memref<24x32xf32, #tpu.memory_space<vmem>>, vector<8x16xf32>
    tpu.vector_store %arg18[%c8_126, %c0_127], %92 {strides = array<i32>} : memref<24x32xf32, #tpu.memory_space<vmem>>, vector<8x16xf32>,
    %c0_128 = arith.constant 0 : index
    %c22_129 = arith.constant 22 : index
    %94 = vector.load %arg17[%c0_128, %c22_129] : memref<8x40xf32, #tpu.memory_space<vmem>>, vector<8x16xf32>
    %c8_130 = arith.constant 8 : index
    %c16_131 = arith.constant 16 : index
    %95 = vector.load %arg18[%c8_130, %c16_131] : memref<24x32xf32, #tpu.memory_space<vmem>>, vector<8x16xf32>
    tpu.vector_store %arg18[%c8_130, %c16_131], %94 {strides = array<i32>} : memref<24x32xf32, #tpu.memory_space<vmem>>, vector<8x16xf32>,
    %c0_132 = arith.constant 0 : index
    %c4_133 = arith.constant 4 : index
    %96 = vector.load %arg17[%c0_132, %c4_133] : memref<8x40xf32, #tpu.memory_space<vmem>>, vector<8x16xf32>
    %c16_134 = arith.constant 16 : index
    %c0_135 = arith.constant 0 : index
    %97 = vector.load %arg18[%c16_134, %c0_135] : memref<24x32xf32, #tpu.memory_space<vmem>>, vector<8x16xf32>
    tpu.vector_store %arg18[%c16_134, %c0_135], %96 {strides = array<i32>} : memref<24x32xf32, #tpu.memory_space<vmem>>, vector<8x16xf32>,
    %c0_136 = arith.constant 0 : index
    %c24_137 = arith.constant 24 : index
    %98 = vector.load %arg17[%c0_136, %c24_137] : memref<8x40xf32, #tpu.memory_space<vmem>>, vector<8x16xf32>
    %c16_138 = arith.constant 16 : index
    %c16_139 = arith.constant 16 : index
    %99 = vector.load %arg18[%c16_138, %c16_139] : memref<24x32xf32, #tpu.memory_space<vmem>>, vector<8x16xf32>
    tpu.vector_store %arg18[%c16_138, %c16_139], %98 {strides = array<i32>} : memref<24x32xf32, #tpu.memory_space<vmem>>, vector<8x16xf32>,
    %c0_140 = arith.constant 0 : index
    %c0_141 = arith.constant 0 : index
    %100 = vector.load %arg9[%c0_140, %c0_141] : memref<8x24xf32, #tpu.memory_space<vmem>>, vector<8x24xf32>
    %c0_142 = arith.constant 0 : index
    %c0_143 = arith.constant 0 : index
    %101 = vector.load %arg18[%c0_142, %c0_143] : memref<24x32xf32, #tpu.memory_space<vmem>>, vector<24x32xf32>
    %cst_144 = arith.constant dense<0.000000e+00> : vector<8x32xf32>
    %102 = tpu.matmul %100, %101, %cst_144 {dimension_numbers = #tpu.dot_dimension_numbers<[1], [0], [0], [1], [0, 0, 1, 1], [], []>} : vector<8x24xf32>, vector<24x32xf32>, vector<8x32xf32> -> vector<8x32xf32>
    %c0_145 = arith.constant 0 : index
    %c0_146 = arith.constant 0 : index
    %103 = vector.load %arg10[%c0_145, %c0_146] : memref<8x1xf32, #tpu.memory_space<vmem>>, vector<8x1xf32>
    %104 = vector.broadcast %103 : vector<8x1xf32> to vector<8x32xf32>
    %105 = arith.addf %102, %104 : vector<8x32xf32>
    %cst_147 = arith.constant 0.000000e+00 : f32
    %106 = vector.broadcast %cst_147 : f32 to vector<8x32xf32>
    %107 = arith.maximumf %105, %106 : vector<8x32xf32>
    %108 = arith.addf %107, %75 : vector<8x32xf32>
    %cst_148 = arith.constant 0.000000e+00 : f32
    %109 = vector.broadcast %cst_148 : f32 to vector<8x32xf32>
    %110 = arith.maximumf %108, %109 : vector<8x32xf32>
    %111 = vector.extract_strided_slice %110 {offsets = [0, 0], sizes = [1, 16], strides = [1, 1]} : vector<8x32xf32> to vector<1x16xf32>
    %c0_149 = arith.constant 0 : index
    %c0_150 = arith.constant 0 : index
    %112 = vector.load %arg19[%c0_149, %c0_150] : memref<2x128xf32, #tpu.memory_space<vmem>>, vector<1x16xf32>
    tpu.vector_store %arg19[%c0_149, %c0_150], %111 {strides = array<i32>} : memref<2x128xf32, #tpu.memory_space<vmem>>, vector<1x16xf32>,
    %113 = vector.extract_strided_slice %110 {offsets = [1, 0], sizes = [1, 16], strides = [1, 1]} : vector<8x32xf32> to vector<1x16xf32>
    %c0_151 = arith.constant 0 : index
    %c16_152 = arith.constant 16 : index
    %114 = vector.load %arg19[%c0_151, %c16_152] : memref<2x128xf32, #tpu.memory_space<vmem>>, vector<1x16xf32>
    tpu.vector_store %arg19[%c0_151, %c16_152], %113 {strides = array<i32>} : memref<2x128xf32, #tpu.memory_space<vmem>>, vector<1x16xf32>,
    %115 = vector.extract_strided_slice %110 {offsets = [2, 0], sizes = [1, 16], strides = [1, 1]} : vector<8x32xf32> to vector<1x16xf32>
    %c0_153 = arith.constant 0 : index
    %c32 = arith.constant 32 : index
    %116 = vector.load %arg19[%c0_153, %c32] : memref<2x128xf32, #tpu.memory_space<vmem>>, vector<1x16xf32>
    tpu.vector_store %arg19[%c0_153, %c32], %115 {strides = array<i32>} : memref<2x128xf32, #tpu.memory_space<vmem>>, vector<1x16xf32>,
    %117 = vector.extract_strided_slice %110 {offsets = [3, 0], sizes = [1, 16], strides = [1, 1]} : vector<8x32xf32> to vector<1x16xf32>
    %c0_154 = arith.constant 0 : index
    %c48 = arith.constant 48 : index
    %118 = vector.load %arg19[%c0_154, %c48] : memref<2x128xf32, #tpu.memory_space<vmem>>, vector<1x16xf32>
    tpu.vector_store %arg19[%c0_154, %c48], %117 {strides = array<i32>} : memref<2x128xf32, #tpu.memory_space<vmem>>, vector<1x16xf32>,
    %119 = vector.extract_strided_slice %110 {offsets = [4, 0], sizes = [1, 16], strides = [1, 1]} : vector<8x32xf32> to vector<1x16xf32>
    %c0_155 = arith.constant 0 : index
    %c64 = arith.constant 64 : index
    %120 = vector.load %arg19[%c0_155, %c64] : memref<2x128xf32, #tpu.memory_space<vmem>>, vector<1x16xf32>
    tpu.vector_store %arg19[%c0_155, %c64], %119 {strides = array<i32>} : memref<2x128xf32, #tpu.memory_space<vmem>>, vector<1x16xf32>,
    %121 = vector.extract_strided_slice %110 {offsets = [5, 0], sizes = [1, 16], strides = [1, 1]} : vector<8x32xf32> to vector<1x16xf32>
    %c0_156 = arith.constant 0 : index
    %c80 = arith.constant 80 : index
    %122 = vector.load %arg19[%c0_156, %c80] : memref<2x128xf32, #tpu.memory_space<vmem>>, vector<1x16xf32>
    tpu.vector_store %arg19[%c0_156, %c80], %121 {strides = array<i32>} : memref<2x128xf32, #tpu.memory_space<vmem>>, vector<1x16xf32>,
    %123 = vector.extract_strided_slice %110 {offsets = [6, 0], sizes = [1, 16], strides = [1, 1]} : vector<8x32xf32> to vector<1x16xf32>
    %c0_157 = arith.constant 0 : index
    %c96 = arith.constant 96 : index
    %124 = vector.load %arg19[%c0_157, %c96] : memref<2x128xf32, #tpu.memory_space<vmem>>, vector<1x16xf32>
    tpu.vector_store %arg19[%c0_157, %c96], %123 {strides = array<i32>} : memref<2x128xf32, #tpu.memory_space<vmem>>, vector<1x16xf32>,
    %125 = vector.extract_strided_slice %110 {offsets = [7, 0], sizes = [1, 16], strides = [1, 1]} : vector<8x32xf32> to vector<1x16xf32>
    %c0_158 = arith.constant 0 : index
    %c112 = arith.constant 112 : index
    %126 = vector.load %arg19[%c0_158, %c112] : memref<2x128xf32, #tpu.memory_space<vmem>>, vector<1x16xf32>
    tpu.vector_store %arg19[%c0_158, %c112], %125 {strides = array<i32>} : memref<2x128xf32, #tpu.memory_space<vmem>>, vector<1x16xf32>,
    %127 = vector.extract_strided_slice %110 {offsets = [0, 16], sizes = [1, 16], strides = [1, 1]} : vector<8x32xf32> to vector<1x16xf32>
    %c1 = arith.constant 1 : index
    %c0_159 = arith.constant 0 : index
    %128 = vector.load %arg19[%c1, %c0_159] : memref<2x128xf32, #tpu.memory_space<vmem>>, vector<1x16xf32>
    tpu.vector_store %arg19[%c1, %c0_159], %127 {strides = array<i32>} : memref<2x128xf32, #tpu.memory_space<vmem>>, vector<1x16xf32>,
    %129 = vector.extract_strided_slice %110 {offsets = [1, 16], sizes = [1, 16], strides = [1, 1]} : vector<8x32xf32> to vector<1x16xf32>
    %c1_160 = arith.constant 1 : index
    %c16_161 = arith.constant 16 : index
    %130 = vector.load %arg19[%c1_160, %c16_161] : memref<2x128xf32, #tpu.memory_space<vmem>>, vector<1x16xf32>
    tpu.vector_store %arg19[%c1_160, %c16_161], %129 {strides = array<i32>} : memref<2x128xf32, #tpu.memory_space<vmem>>, vector<1x16xf32>,
    %131 = vector.extract_strided_slice %110 {offsets = [2, 16], sizes = [1, 16], strides = [1, 1]} : vector<8x32xf32> to vector<1x16xf32>
    %c1_162 = arith.constant 1 : index
    %c32_163 = arith.constant 32 : index
    %132 = vector.load %arg19[%c1_162, %c32_163] : memref<2x128xf32, #tpu.memory_space<vmem>>, vector<1x16xf32>
    tpu.vector_store %arg19[%c1_162, %c32_163], %131 {strides = array<i32>} : memref<2x128xf32, #tpu.memory_space<vmem>>, vector<1x16xf32>,
    %133 = vector.extract_strided_slice %110 {offsets = [3, 16], sizes = [1, 16], strides = [1, 1]} : vector<8x32xf32> to vector<1x16xf32>
    %c1_164 = arith.constant 1 : index
    %c48_165 = arith.constant 48 : index
    %134 = vector.load %arg19[%c1_164, %c48_165] : memref<2x128xf32, #tpu.memory_space<vmem>>, vector<1x16xf32>
    tpu.vector_store %arg19[%c1_164, %c48_165], %133 {strides = array<i32>} : memref<2x128xf32, #tpu.memory_space<vmem>>, vector<1x16xf32>,
    %135 = vector.extract_strided_slice %110 {offsets = [4, 16], sizes = [1, 16], strides = [1, 1]} : vector<8x32xf32> to vector<1x16xf32>
    %c1_166 = arith.constant 1 : index
    %c64_167 = arith.constant 64 : index
    %136 = vector.load %arg19[%c1_166, %c64_167] : memref<2x128xf32, #tpu.memory_space<vmem>>, vector<1x16xf32>
    tpu.vector_store %arg19[%c1_166, %c64_167], %135 {strides = array<i32>} : memref<2x128xf32, #tpu.memory_space<vmem>>, vector<1x16xf32>,
    %137 = vector.extract_strided_slice %110 {offsets = [5, 16], sizes = [1, 16], strides = [1, 1]} : vector<8x32xf32> to vector<1x16xf32>
    %c1_168 = arith.constant 1 : index
    %c80_169 = arith.constant 80 : index
    %138 = vector.load %arg19[%c1_168, %c80_169] : memref<2x128xf32, #tpu.memory_space<vmem>>, vector<1x16xf32>
    tpu.vector_store %arg19[%c1_168, %c80_169], %137 {strides = array<i32>} : memref<2x128xf32, #tpu.memory_space<vmem>>, vector<1x16xf32>,
    %139 = vector.extract_strided_slice %110 {offsets = [6, 16], sizes = [1, 16], strides = [1, 1]} : vector<8x32xf32> to vector<1x16xf32>
    %c1_170 = arith.constant 1 : index
    %c96_171 = arith.constant 96 : index
    %140 = vector.load %arg19[%c1_170, %c96_171] : memref<2x128xf32, #tpu.memory_space<vmem>>, vector<1x16xf32>
    tpu.vector_store %arg19[%c1_170, %c96_171], %139 {strides = array<i32>} : memref<2x128xf32, #tpu.memory_space<vmem>>, vector<1x16xf32>,
    %141 = vector.extract_strided_slice %110 {offsets = [7, 16], sizes = [1, 16], strides = [1, 1]} : vector<8x32xf32> to vector<1x16xf32>
    %c1_172 = arith.constant 1 : index
    %c112_173 = arith.constant 112 : index
    %142 = vector.load %arg19[%c1_172, %c112_173] : memref<2x128xf32, #tpu.memory_space<vmem>>, vector<1x16xf32>
    tpu.vector_store %arg19[%c1_172, %c112_173], %141 {strides = array<i32>} : memref<2x128xf32, #tpu.memory_space<vmem>>, vector<1x16xf32>,
    %c0_174 = arith.constant 0 : index
    %c0_175 = arith.constant 0 : index
    %143 = vector.load %arg19[%c0_174, %c0_175] : memref<2x128xf32, #tpu.memory_space<vmem>>, vector<2x128xf32>
    %c0_176 = arith.constant 0 : index
    %c0_177 = arith.constant 0 : index
    %144 = vector.load %arg11[%c0_176, %c0_177] : memref<128x32xf32, #tpu.memory_space<vmem>>, vector<128x32xf32>
    %cst_178 = arith.constant dense<0.000000e+00> : vector<2x32xf32>
    %145 = tpu.matmul %143, %144, %cst_178 {dimension_numbers = #tpu.dot_dimension_numbers<[1], [0], [0], [1], [0, 0, 1, 1], [], []>} : vector<2x128xf32>, vector<128x32xf32>, vector<2x32xf32> -> vector<2x32xf32>
    %c0_179 = arith.constant 0 : index
    %c0_180 = arith.constant 0 : index
    %146 = vector.load %arg12[%c0_179, %c0_180] : memref<1x32xf32, #tpu.memory_space<vmem>>, vector<1x32xf32>
    %147 = vector.broadcast %146 : vector<1x32xf32> to vector<2x32xf32>
    %148 = arith.addf %145, %147 : vector<2x32xf32>
    %cst_181 = arith.constant 0.000000e+00 : f32
    %149 = vector.broadcast %cst_181 : f32 to vector<2x32xf32>
    %150 = arith.maximumf %148, %149 : vector<2x32xf32>
    %c0_182 = arith.constant 0 : index
    %c0_183 = arith.constant 0 : index
    %151 = vector.load %arg13[%c0_182, %c0_183] : memref<32x5xf32, #tpu.memory_space<vmem>>, vector<32x5xf32>
    %cst_184 = arith.constant dense<0.000000e+00> : vector<2x5xf32>
    %152 = tpu.matmul %150, %151, %cst_184 {dimension_numbers = #tpu.dot_dimension_numbers<[1], [0], [0], [1], [0, 0, 1, 1], [], []>} : vector<2x32xf32>, vector<32x5xf32>, vector<2x5xf32> -> vector<2x5xf32>
    %c0_185 = arith.constant 0 : index
    %c0_186 = arith.constant 0 : index
    %153 = vector.load %arg14[%c0_185, %c0_186] : memref<1x5xf32, #tpu.memory_space<vmem>>, vector<1x5xf32>
    %154 = vector.broadcast %153 : vector<1x5xf32> to vector<2x5xf32>
    %155 = arith.addf %152, %154 : vector<2x5xf32>
    %c0_187 = arith.constant 0 : index
    %c0_188 = arith.constant 0 : index
    %156 = vector.load %arg15[%c0_187, %c0_188] : memref<2x5xf32, #tpu.memory_space<vmem>>, vector<2x5xf32>
    tpu.vector_store %arg15[%c0_187, %c0_188], %155 {strides = array<i32>} : memref<2x5xf32, #tpu.memory_space<vmem>>, vector<2x5xf32>,
    return
  }
}

</mosaic_0001>

<bundles_post_ra>
// kernel: tpu_custom_call.1
= control target key start
LH: loop header
LB: loop body
LE: loop exit
PB: predicated region body
PF: predicated region fallthrough
CT: control target
= control target key end

     0   :  { %s1119_s22 = smov 126   ;;  %s1120_s23 = smov 122   ;;  %vm54_vm0 = vcmask 261120   ;;  %s1449_s0 = inlined_call_operand.vmem [shape: f32[4,40], index: 0, kind: input, shape index: {}]   ;;  %s1450_s1 = inlined_call_operand.vmem [shape: f32[8,24], index: 1, kind: input, shape index: {}]   ;;  %s1451_s2 = inlined_call_operand.vmem [shape: f32[8,1], index: 2, kind: input, shape index: {}]   ;;  %s1452_s3 = inlined_call_operand.vmem [shape: f32[8,24], index: 3, kind: input, shape index: {}]   ;;  %s1453_s4 = inlined_call_operand.vmem [shape: f32[8,1], index: 4, kind: input, shape index: {}]   ;;  %s1454_s5 = inlined_call_operand.vmem [shape: f32[8,4], index: 5, kind: input, shape index: {}]   ;;  %s1455_s6 = inlined_call_operand.vmem [shape: f32[8,1], index: 6, kind: input, shape index: {}]   ;;  %s1456_s7 = inlined_call_operand.vmem [shape: f32[8,24], index: 7, kind: input, shape index: {}]   ;;  %s1457_s8 = inlined_call_operand.vmem [shape: f32[8,1], index: 8, kind: input, shape index: {}]   ;;  %s1458_s9 = inlined_call_operand.vmem [shape: f32[8,24], index: 9, kind: input, shape index: {}]   ;;  %s1459_s10 = inlined_call_operand.vmem [shape: f32[8,1], index: 10, kind: input, shape index: {}]   ;;  %s1460_s11 = inlined_call_operand.vmem [shape: f32[128,32], index: 11, kind: input, shape index: {}]   ;;  %s1461_s12 = inlined_call_operand.vmem [shape: f32[1,32], index: 12, kind: input, shape index: {}]   ;;  %s1462_s13 = inlined_call_operand.vmem [shape: f32[32,5], index: 13, kind: input, shape index: {}]   ;;  %s1463_s14 = inlined_call_operand.vmem [shape: f32[1,5], index: 14, kind: input, shape index: {}]   ;;  %s1464_s15 = inlined_call_operand.hbm [shape: f32[2,5], index: 15, kind: output, shape index: {}]  }
   0x1   :  { %v58_v0 = vld [vmem:[%s1449_s0] sm:$0xf] }
   0x2   :  { %v65_v1 = vld [vmem:[%s1449_s0] sm:$0xf]  ;;  %60 = vrot.lane.b32.xlu0 %v58_v0, %s1119_s22 }
   0x3   :  { %67 = vrot.lane.b32.xlu1 %v65_v1, %s1120_s23  ;;  %v72_v2 = vld [vmem:[%s1449_s0] sm:$0xf] }
   0x4   :  { %v78_v3 = vld [vmem:[%s1449_s0] sm:$0xf] }
   0x5   :  { %20 = vsyncpa [#allocation7], 0  ;;  %v1121_v4 = vmov 0.0   ;;  %s1122_s28 = smov 125   ;;  %s1123_s29 = smov 121   ;;  %v1124_v7 = vmov 0.0|0.0  }
   0x6   :  { %55 = vst.msk [vmem:[#allocation4] sm:$0xff] %vm54_vm0, %v1121_v4  ;;  %56 = vst.msk [vmem:[#allocation4 + $0x8] sm:$0xff] %vm54_vm0, %v1121_v4  ;;  %962 = vmatprep.subr.mxu1 %v1121_v4  ;;  %74 = vrot.lane.b32.xlu0 %v72_v2, %s1122_s28  ;;  %v84_v5 = vld [vmem:[%s1449_s0] sm:$0xf]  ;;  %vm1125_vm1 = vmmov 0   ;;  %s1126_s19 = smov 124  }
   0x7   :  { %57 = vst.msk [vmem:[#allocation4 + $0x10] sm:$0xff] %vm54_vm0, %v1121_v4  ;;  %80 = vrot.lane.b32.xlu1 %v78_v3, %s1123_s29  ;;  %v90_v6 = vld [vmem:[%s1449_s0] sm:$0xf]  ;;  %1031 = vmatprep.subr.bf16.mxu0 %v1124_v7  ;;  %s1127_s20 = smov 120   ;;  %v1128_v8 = vmov 0   ;;  %vm63_vm2 = vcmask 125952  }
   0x8   :  { %950 = vmatprep.mubr.msk.f32.mxu0 %vm1125_vm1, %v1121_v4  ;;  %964 = vmatprep.mubr.msk.f32.mxu1 %vm1125_vm1, %v1121_v4  ;;  %v101_v9 = vld [vmem:[%s1451_s2] sm:$0xff]  ;;  %vm70_vm3 = vcmask 257152   ;;  %vm326_vm4 = vcmask 1043456   ;;  %vm107_vm5 = vcmask 195584   ;;  %vm51_vm6 = vcmask 326656   ;;  %s1130_s25 = smov 8  }
   0x9   :  { %1093 = vset.pattern.permute.xlu0 %v1128_v8  ;;  %1094 = vset.pattern.permute.xlu1 %v1128_v8  ;;  %v97_v21 = vld [vmem:[%s1450_s1] sm:$0xff]  ;;  %52 = vst.msk [vmem:[#allocation2] sm:$0xff] %vm51_vm6, %v1121_v4  ;;  %53 = vst.msk [vmem:[#allocation3] sm:$0xff] %vm51_vm6, %v1121_v4  ;;  %s1129_s1 = smov 4   ;;  %vm186_vm7 = vcmask 162848   ;;  %vm191_vm8 = vcmask 326848  }
   0xa   :  { %86 = vrot.lane.b32.xlu0 %v84_v5, %s1126_s19  ;;  %v315_v30 = vld [vmem:[%s1454_s5] sm:$0xff]  ;;  %vm322_vm9 = vcmask 31744   ;;  %vm198_vm10 = vcmask 130048   ;;  %vm205_vm11 = vcmask 261248   ;;  %vm654_vm12 = vcmask 122880   ;;  %s1132_s21 = smov 112  }
   0xb   :  { %92 = vrot.lane.b32.xlu1 %v90_v6, %s1127_s20  ;;  %v235_v31 = vld [vmem:[%s1453_s4] sm:$0xff]  ;;  %s1135_s26 = smov 80   ;;  %s1136_s27 = smov 64   ;;  %vm660_vm13 = vcmask 255105   ;;  %vm665_vm14 = vcmask 387330   ;;  %vm670_vm15 = vcmask 519555  }
   0xc   :  { %v316_v32 = vld [vmem:[%s1455_s6] sm:$0xff] }
   0xd   :  { %v231_v43 = vld [vmem:[%s1452_s3] sm:$0xff] }
   0xe   :  { %104 = vperm.xlu0 %1093, %v101_v9   ;;  %v447_v58 = vld [vmem:[%s1457_s8] sm:$0xff] }
   0xf   :  { %v444_v3 = vld [vmem:[%s1456_s7] sm:$0xff] }
  0x74   :  { %v61_v10 = vpop.permute.xlu0 %60 }
  0x75   :  { %v68_v11 = vpop.permute.xlu1 %67  ;;  %64 = vst.msk [vmem:[#allocation4] sm:$0xf] %vm63_vm2, %v61_v10 }
  0x76   :  { %71 = vst.msk [vmem:[#allocation4] sm:$0xf] %vm70_vm3, %v68_v11 }
  0x78   :  { %v75_v12 = vpop.permute.xlu0 %74 }
  0x79   :  { %v81_v13 = vpop.permute.xlu1 %80  ;;  %77 = vst.msk [vmem:[#allocation4 + $0x8] sm:$0xf] %vm63_vm2, %v75_v12 }
  0x7a   :  { %83 = vst.msk [vmem:[#allocation4 + $0x8] sm:$0xf] %vm70_vm3, %v81_v13 }
  0x7c   :  { %v87_v14 = vpop.permute.xlu0 %86 }
  0x7d   :  { %v93_v15 = vpop.permute.xlu1 %92  ;;  %89 = vst.msk [vmem:[#allocation4 + $0x10] sm:$0xf] %vm63_vm2, %v87_v14  ;;  %v98_v16 = vld [vmem:[#allocation4] sm:$0xff]  ;;  %vm680_vm2 = vcmask 784005  }
  0x7e   :  { %95 = vst.msk [vmem:[#allocation4 + $0x10] sm:$0xf] %vm70_vm3, %v93_v15  ;;  %v572_v15 = vld [vmem:[%s1459_s10] sm:$0xff]  ;;  %vm685_vm3 = vcmask 916230   ;;  %s1138_s10 = smov [#allocation6]  }
  0x81   :  { %v99_v17 = vld [vmem:[#allocation4 + $0x8] sm:$0xff] }
  0x82   :  { %v1032_v18 = vpack.c.bf16 %v99_v17, %v98_v16 }
  0x84   :  { %1033 = vmatpush3.bf16.msra.mxu0 %v1032_v18 }
  0x85   :  { %948 = vmatprep.subr.mxu0 %v1121_v4  ;;  %v100_v19 = vld [vmem:[#allocation4 + $0x10] sm:$0xff] }
  0x86   :  { %v96_v20 = vld [vmem:[#allocation4 + $0x10] sm:$0xf] }
  0x87   :  { %963 = vmatpush3.msk.msra.mxu1 %vm326_vm4, %v96_v20  ;;  %vm690_vm4 = vcmask 1048455  }
  0x88   :  { %1043 = vmatprep.subr.bf16.mxu1 %v1124_v7  ;;  %949 = vmatpush3.msra.mxu0 %v100_v19 }
  0x89   :  { %951 = vmatmul.mubr.msk.f32.vlgmr.msra.gmra.mrb[0].mxu0 %vm107_vm5, %v97_v21  ;;  %1034 = vmatprep.subr.bf16.mxu0 %v1124_v7 }
  0x8a   :  { %959 = vmatprep.mubr.msk.f32.mxu0 %vm1125_vm1, %v1121_v4  ;;  %965 = vmatmul.mubr.msk.f32.vlgmr.msra.gmra.mrb[0].mxu1 %vm322_vm9, %v315_v30  ;;  %v704_v30 = vld [vmem:[%s1460_s11 + $0x18] sm:$0xff] }
  0x8b   :  { %1017 = vmatprep.mubr.msk.f32.mxu1 %vm1125_vm1, %v1121_v4 }
  0x8d   :  { %v105_v22 = vpop.permute.xlu0 %104 }
 0x15c   :  { %v177_v23 = vpop.f32.mrb[0].mxu0 }
 0x15d   :  { %v178_v24 = vadd.f32 %v177_v23, %v105_v22  ;;  %v952_v25 = vpop.f32.mrb[1].mxu0  ;;  %v396_v44 = vpop.f32.mrb[0].mxu1 }
 0x15e   :  { %v966_v45 = vpop.f32.mrb[1].mxu1 }
 0x15f   :  { %v181_v26 = vmax.f32 %v178_v24, 0.0  ;;  %v568_v24 = vld [vmem:[%s1458_s9] sm:$0xff]  ;;  %v711_v45 = vld [vmem:[%s1460_s11 + $0x50] sm:$0xff] }
 0x161   :  { %183 = vrot.lane.b32.xlu1 %v181_v26, %s1129_s1 }
 0x165   :  { %188 = vrot.lane.b32.xlu1 %v181_v26, %s1130_s25  ;;  %v701_v26 = vld [vmem:[%s1460_s11] sm:$0xff] }
 0x1d3   :  { %v184_v27 = vpop.permute.xlu1 %183 }
 0x1d4   :  { %187 = vst.msk [vmem:[#allocation2] sm:$0xff] %vm186_vm7, %v184_v27  ;;  %v702_v27 = vld [vmem:[%s1460_s11 + $0x8] sm:$0xff] }
 0x1d7   :  { %v189_v28 = vpop.permute.xlu1 %188 }
 0x1d8   :  { %192 = vst.msk [vmem:[#allocation2] sm:$0xff] %vm191_vm8, %v189_v28  ;;  %v703_v28 = vld [vmem:[%s1460_s11 + $0x10] sm:$0xff] }
 0x1df   :  { %v207_v29 = vld [vmem:[#allocation2] sm:$0xff] }
 0x1e0   :  { %209 = vrot.lane.b32.xlu1 %v207_v29, %s1122_s28  ;;  %195 = vrot.lane.b32.xlu0 %v207_v29, %s1119_s22 }
 0x1e4   :  { %215 = vrot.lane.b32.xlu1 %v207_v29, %s1123_s29  ;;  %202 = vrot.lane.b32.xlu0 %v207_v29, %s1120_s23 }
 0x1e8   :  { %227 = vrot.lane.b32.xlu1 %v207_v29, %s1127_s20  ;;  %221 = vrot.lane.b32.xlu0 %v207_v29, %s1126_s19  ;;  %v1044_v29 = vpack.c.bf16 %v702_v27, %v701_v26 }
 0x1ea   :  { %1045 = vmatpush3.bf16.msra.mxu1 %v1044_v29 }
 0x1eb   :  { %1046 = vmatprep.subr.bf16.mxu1 %v1124_v7 }
 0x1ec   :  { %238 = vperm.xlu0 %1093, %v235_v31   ;;  %319 = vperm.xlu1 %1094, %v316_v32   ;;  %v1047_v31 = vpack.c.bf16 %v704_v30, %v703_v28  ;;  %v706_v32 = vld [vmem:[%s1460_s11 + $0x28] sm:$0xff] }
 0x1ee   :  { %1048 = vmatpush3.bf16.msra.mxu1 %v1047_v31 }
 0x1ef   :  { %1049 = vmatprep.subr.bf16.mxu1 %v1124_v7 }
 0x252   :  { %v210_v33 = vpop.permute.xlu1 %209  ;;  %v196_v34 = vpop.permute.xlu0 %195 }
 0x253   :  { %212 = vst.msk [vmem:[#allocation4 + $0x8] sm:$0xff] %vm198_vm10, %v210_v33  ;;  %199 = vst.msk [vmem:[#allocation4] sm:$0xff] %vm198_vm10, %v196_v34  ;;  %v707_v34 = vld [vmem:[%s1460_s11 + $0x30] sm:$0xff] }
 0x256   :  { %v216_v35 = vpop.permute.xlu1 %215  ;;  %v203_v36 = vpop.permute.xlu0 %202 }
 0x257   :  { %218 = vst.msk [vmem:[#allocation4 + $0x8] sm:$0xff] %vm205_vm11, %v216_v35  ;;  %206 = vst.msk [vmem:[#allocation4] sm:$0xff] %vm205_vm11, %v203_v36  ;;  %v708_v35 = vld [vmem:[%s1460_s11 + $0x38] sm:$0xff] }
 0x258   :  { %v1053_v36 = vpack.c.bf16 %v708_v35, %v707_v34 }
 0x25a   :  { %v228_v37 = vpop.permute.xlu1 %227  ;;  %v222_v38 = vpop.permute.xlu0 %221 }
 0x25b   :  { %224 = vst.msk [vmem:[#allocation4 + $0x10] sm:$0xff] %vm198_vm10, %v222_v38  ;;  %v710_v38 = vld [vmem:[%s1460_s11 + $0x48] sm:$0xff] }
 0x25c   :  { %230 = vst.msk [vmem:[#allocation4 + $0x10] sm:$0xff] %vm205_vm11, %v228_v37  ;;  %v709_v37 = vld [vmem:[%s1460_s11 + $0x40] sm:$0xff] }
 0x25e   :  { %v232_v39 = vld [vmem:[#allocation4] sm:$0xff]  ;;  %v233_v40 = vld [vmem:[#allocation4 + $0x8] sm:$0xff] }
 0x25f   :  { %v1035_v41 = vpack.c.bf16 %v233_v40, %v232_v39 }
 0x261   :  { %1036 = vmatpush3.bf16.msra.mxu0 %v1035_v41  ;;  %v1056_v41 = vpack.c.bf16 %v710_v38, %v709_v37 }
 0x262   :  { %957 = vmatprep.subr.mxu0 %v1121_v4 }
 0x263   :  { %v234_v42 = vld [vmem:[#allocation4 + $0x10] sm:$0xff] }
 0x265   :  { %958 = vmatpush3.msra.mxu0 %v234_v42 }
 0x266   :  { %960 = vmatmul.mubr.msk.f32.vlgmr.msra.gmra.mrb[2].mxu0 %vm107_vm5, %v231_v43  ;;  %1037 = vmatprep.subr.bf16.mxu0 %v1124_v7 }
 0x267   :  { %973 = vmatprep.mubr.msk.f32.mxu0 %vm1125_vm1, %v1121_v4 }
 0x26b   :  { %v320_v46 = vpop.permute.xlu1 %319  ;;  %v239_v47 = vpop.permute.xlu0 %238 }
 0x26c   :  { %v397_v51 = vadd.f32 %v396_v44, %v320_v46  ;;  %v712_v46 = vld [vmem:[%s1460_s11 + $0x58] sm:$0xff] }
 0x339   :  { %v310_v48 = vpop.f32.mrb[2].mxu0 }
 0x33a   :  { %v311_v49 = vadd.f32 %v310_v48, %v239_v47  ;;  %v961_v50 = vpop.f32.mrb[3].mxu0  ;;  %v1059_v47 = vpack.c.bf16 %v712_v46, %v711_v45 }
 0x33b   :  { %v713_v50 = vld [vmem:[%s1460_s11 + $0x60] sm:$0xff] }
 0x33c   :  { %v314_v52 = vmax.f32 %v311_v49, 0.0 }
 0x33e   :  { %v400_v53 = vadd.f32 %v397_v51, %v314_v52  ;;  %v714_v51 = vld [vmem:[%s1460_s11 + $0x68] sm:$0xff] }
 0x33f   :  { %v1062_v52 = vpack.c.bf16 %v714_v51, %v713_v50 }
 0x340   :  { %v401_v54 = vmax.f32 %v400_v53, 0.0  ;;  %v715_v53 = vld [vmem:[%s1460_s11 + $0x70] sm:$0xff] }
 0x342   :  { %407 = vrot.lane.b32.xlu1 %v401_v54, %s1130_s25  ;;  %403 = vrot.lane.b32.xlu0 %v401_v54, %s1129_s1  ;;  %v716_v54 = vld [vmem:[%s1460_s11 + $0x78] sm:$0xff] }
 0x3b4   :  { %v408_v55 = vpop.permute.xlu1 %407  ;;  %v404_v56 = vpop.permute.xlu0 %403 }
 0x3b5   :  { %406 = vst.msk [vmem:[#allocation2] sm:$0xff] %vm186_vm7, %v404_v56  ;;  %v795_v56 = vld [vmem:[%s1462_s13] sm:$0xff] }
 0x3b6   :  { %410 = vst.msk [vmem:[#allocation2] sm:$0xff] %vm191_vm8, %v408_v55  ;;  %v1065_v55 = vpack.c.bf16 %v716_v54, %v715_v53 }
 0x3bd   :  { %v419_v57 = vld [vmem:[#allocation2] sm:$0xff] }
 0x3be   :  { %421 = vrot.lane.b32.xlu0 %v419_v57, %s1119_s22  ;;  %415 = vrot.lane.b32.xlu1 %v419_v57, %s1126_s19  ;;  %412 = vst.msk [vmem:[#allocation4] sm:$0xff] %vm198_vm10, %v419_v57 }
 0x3c2   :  { %427 = vrot.lane.b32.xlu0 %v419_v57, %s1120_s23  ;;  %433 = vrot.lane.b32.xlu1 %v419_v57, %s1126_s19 }
 0x3c6   :  { %439 = vrot.lane.b32.xlu0 %v419_v57, %s1127_s20  ;;  %450 = vperm.xlu1 %1094, %v447_v58   ;;  %v796_v57 = vld [vmem:[%s1462_s13 + $0x8] sm:$0xff] }
 0x3c7   :  { %v1068_v58 = vpack.c.bf16 %v796_v57, %v795_v56 }
 0x430   :  { %v422_v59 = vpop.permute.xlu0 %421  ;;  %v416_v60 = vpop.permute.xlu1 %415 }
 0x431   :  { %424 = vst.msk [vmem:[#allocation4 + $0x8] sm:$0xff] %vm198_vm10, %v422_v59 }
 0x432   :  { %418 = vst.msk [vmem:[#allocation4] sm:$0xff] %vm205_vm11, %v416_v60 }
 0x434   :  { %v428_v61 = vpop.permute.xlu0 %427  ;;  %v434_v62 = vpop.permute.xlu1 %433 }
 0x435   :  { %430 = vst.msk [vmem:[#allocation4 + $0x8] sm:$0xff] %vm205_vm11, %v428_v61 }
 0x436   :  { %436 = vst.msk [vmem:[#allocation4 + $0x10] sm:$0xff] %vm198_vm10, %v434_v62 }
 0x438   :  { %v440_v63 = vpop.permute.xlu0 %439 }
 0x439   :  { %442 = vst.msk [vmem:[#allocation4 + $0x10] sm:$0xff] %vm205_vm11, %v440_v63  ;;  %v445_v0 = vld [vmem:[#allocation4] sm:$0xff] }
 0x43c   :  { %v446_v1 = vld [vmem:[#allocation4 + $0x8] sm:$0xff] }
 0x43d   :  { %v1038_v2 = vpack.c.bf16 %v446_v1, %v445_v0 }
 0x43f   :  { %1039 = vmatpush3.bf16.msra.mxu0 %v1038_v2  ;;  %v797_v2 = vld [vmem:[%s1462_s13 + $0x10] sm:$0xff] }
 0x440   :  { %971 = vmatprep.subr.mxu0 %v1121_v4  ;;  %v1326_v5 = vld [vmem:[#allocation4 + $0x10] sm:$0xff] }
 0x443   :  { %972 = vmatpush3.msra.mxu0 %v1326_v5 }
 0x444   :  { %974 = vmatmul.mubr.msk.f32.vlgmr.msra.gmra.mrb[4].mxu0 %vm107_vm5, %v444_v3  ;;  %1040 = vmatprep.subr.bf16.mxu0 %v1124_v7  ;;  %v798_v3 = vld [vmem:[%s1462_s13 + $0x18] sm:$0xff] }
 0x445   :  { %982 = vmatprep.mubr.msk.f32.mxu0 %vm1125_vm1, %v1121_v4  ;;  %v451_v6 = vpop.permute.xlu1 %450 }
 0x517   :  { %v522_v8 = vpop.f32.mrb[4].mxu0 }
 0x518   :  { %v523_v9 = vadd.f32 %v522_v8, %v451_v6  ;;  %v975_v10 = vpop.f32.mrb[5].mxu0  ;;  %v901_v6 = vld [vmem:[%s1461_s12] ss:$0 sm:$0xff] }
 0x51a   :  { %v526_v11 = vmax.f32 %v523_v9, 0.0 }
 0x51c   :  { %532 = vrot.lane.b32.xlu1 %v526_v11, %s1130_s25  ;;  %528 = vrot.lane.b32.xlu0 %v526_v11, %s1129_s1  ;;  %s1133_s1 = smov 48   ;;  %s1134_s25 = smov 32  }
 0x58e   :  { %v533_v12 = vpop.permute.xlu1 %532  ;;  %v529_v13 = vpop.permute.xlu0 %528 }
 0x58f   :  { %531 = vst.msk [vmem:[#allocation3] sm:$0xff] %vm186_vm7, %v529_v13 }
 0x590   :  { %535 = vst.msk [vmem:[#allocation3] sm:$0xff] %vm191_vm8, %v533_v12  ;;  %v902_v12 = vld [vmem:[%s1463_s14] ss:$0 sm:$0xff] }
 0x597   :  { %v544_v14 = vld [vmem:[#allocation3] sm:$0xff] }
 0x598   :  { %546 = vrot.lane.b32.xlu0 %v544_v14, %s1119_s22  ;;  %540 = vrot.lane.b32.xlu1 %v544_v14, %s1126_s19  ;;  %537 = vst.msk [vmem:[#allocation4] sm:$0xff] %vm198_vm10, %v544_v14  ;;  %s887_s22 = sshll.u32 %s1138_s10, 4  ;;  %s888_s22 = int_to_ptr.vmem [resolvable:$true] %s887_s22 }
 0x599   :  { %s1095_s13 = scalar_lea.vmem %s888_s22, 32  ;;  %p1100_p1 = scmp.lt.s32.totalorder %s888_s22, %s888_s22 }
 0x59a   :  { %p1096_p0 = scmp.ne.s32.totalorder %s888_s22, %s1095_s13  ;;  %p1101_p2 = scmp.lt.s32.totalorder %s1095_s13, %s1095_s13 }
 0x59c   :  { %552 = vrot.lane.b32.xlu0 %v544_v14, %s1120_s23  ;;  %558 = vrot.lane.b32.xlu1 %v544_v14, %s1126_s19  ;;  %p1102_p3 = por %p1101_p2, %p1100_p1 }
 0x59e   :  { %p1103_p4 = pnand %p1102_p3, %p1096_p0 }
 0x5a0   :  { %564 = vrot.lane.b32.xlu0 %v544_v14, %s1127_s20  ;;  %575 = vperm.xlu1 %1094, %v572_v15   ;;  %s1131_s20 = smov 16  }
 0x60a   :  { %v547_v16 = vpop.permute.xlu0 %546  ;;  %v541_v17 = vpop.permute.xlu1 %540 }
 0x60b   :  { %549 = vst.msk [vmem:[#allocation4 + $0x8] sm:$0xff] %vm198_vm10, %v547_v16 }
 0x60c   :  { %543 = vst.msk [vmem:[#allocation4] sm:$0xff] %vm205_vm11, %v541_v17 }
 0x60e   :  { %v553_v18 = vpop.permute.xlu0 %552  ;;  %v559_v19 = vpop.permute.xlu1 %558 }
 0x60f   :  { %555 = vst.msk [vmem:[#allocation4 + $0x8] sm:$0xff] %vm205_vm11, %v553_v18 }
 0x610   :  { %561 = vst.msk [vmem:[#allocation4 + $0x10] sm:$0xff] %vm198_vm10, %v559_v19 }
 0x612   :  { %v565_v20 = vpop.permute.xlu0 %564 }
 0x613   :  { %567 = vst.msk [vmem:[#allocation4 + $0x10] sm:$0xff] %vm205_vm11, %v565_v20  ;;  %v569_v21 = vld [vmem:[#allocation4] sm:$0xff] }
 0x616   :  { %v570_v22 = vld [vmem:[#allocation4 + $0x8] sm:$0xff] }
 0x617   :  { %v1041_v23 = vpack.c.bf16 %v570_v22, %v569_v21 }
 0x619   :  { %1042 = vmatpush3.bf16.msra.mxu0 %v1041_v23 }
 0x61a   :  { %980 = vmatprep.subr.mxu0 %v1121_v4  ;;  %v571_v25 = vld [vmem:[#allocation4 + $0x10] sm:$0xff] }
 0x61d   :  { %981 = vmatpush3.msra.mxu0 %v571_v25 }
 0x61e   :  { %983 = vmatmul.mubr.msk.f32.vlgmr.msra.gmra.mrb[6].mxu0 %vm107_vm5, %v568_v24  ;;  %1067 = vmatprep.subr.bf16.mxu0 %v1124_v7  ;;  %vm879_vm5 = vcmask 33792  }
 0x61f   :  { %1028 = vmatprep.mubr.msk.f32.mxu0 %vm1125_vm1, %v1121_v4  ;;  %v705_v4 = vld [vmem:[%s1460_s11 + $0x20] sm:$0xff]  ;;  %v576_v39 = vpop.permute.xlu1 %575  ;;  %1069 = vmatpush3.bf16.msra.mxu0 %v1068_v58  ;;  %s1137_s11 = smov 96   ;;  %vm675_vm1 = vcmask 651780  }
 0x620   :  { %v1050_v33 = vpack.c.bf16 %v706_v32, %v705_v4  ;;  %1070 = vmatprep.subr.bf16.mxu0 %v1124_v7 }
 0x622   :  { %1051 = vmatpush3.bf16.msra.mxu1 %v1050_v33 }
 0x623   :  { %1052 = vmatprep.subr.bf16.mxu1 %v1124_v7 }
 0x626   :  { %1054 = vmatpush3.bf16.msra.mxu1 %v1053_v36 }
 0x627   :  { %1055 = vmatprep.subr.bf16.mxu1 %v1124_v7 }
 0x62a   :  { %1057 = vmatpush3.bf16.msra.mxu1 %v1056_v41 }
 0x62b   :  { %1058 = vmatprep.subr.bf16.mxu1 %v1124_v7 }
 0x62e   :  { %1060 = vmatpush3.bf16.msra.mxu1 %v1059_v47 }
 0x62f   :  { %1061 = vmatprep.subr.bf16.mxu1 %v1124_v7 }
 0x632   :  { %1063 = vmatpush3.bf16.msra.mxu1 %v1062_v52 }
 0x633   :  { %1064 = vmatprep.subr.bf16.mxu1 %v1124_v7 }
 0x636   :  { %1066 = vmatpush3.bf16.msra.mxu1 %v1065_v55 }
 0x6f1   :  { %v647_v40 = vpop.f32.mrb[6].mxu0 }
 0x6f2   :  { %v648_v42 = vadd.f32 %v647_v40, %v576_v39  ;;  %v984_v43 = vpop.f32.mrb[7].mxu0 }
 0x6f4   :  { %v651_v44 = vmax.f32 %v648_v42, 0.0 }
 0x6f6   :  { %v652_v48 = vadd.f32 %v651_v44, %v1326_v5  ;;  %v1071_v5 = vpack.c.bf16 %v798_v3, %v797_v2 }
 0x6f8   :  { %v653_v49 = vmax.f32 %v652_v48, 0.0  ;;  %1072 = vmatpush3.bf16.msra.mxu0 %v1071_v5 }
 0x6fa   :  { %657 = vrot.lane.b32.xlu1 %v653_v49, %s1131_s20  ;;  %687 = vrot.lane.b32.xlu0 %v653_v49, %s1132_s21  ;;  %655 = vst.msk [vmem:[#allocation5] sm:$0x1] %vm654_vm12, %v653_v49 }
 0x6fe   :  { %667 = vrot.lane.b32.xlu1 %v653_v49, %s1133_s1  ;;  %662 = vrot.lane.b32.xlu0 %v653_v49, %s1134_s25 }
 0x702   :  { %677 = vrot.lane.b32.xlu1 %v653_v49, %s1135_s26  ;;  %672 = vrot.lane.b32.xlu0 %v653_v49, %s1136_s27 }
 0x706   :  { %682 = vrot.lane.b32.xlu0 %v653_v49, %s1137_s11 }
 0x76c   :  { %v658_v59 = vpop.permute.xlu1 %657  ;;  %v688_v60 = vpop.permute.xlu0 %687 }
 0x76d   :  { %661 = vst.msk [vmem:[#allocation5 - $0x1] sm:$0x2] %vm660_vm13, %v658_v59 }
 0x76e   :  { %692 = vst.msk [vmem:[#allocation5 + $0x1] sm:$0x1] %vm654_vm12, %v688_v60 }
 0x76f   :  { %693 = vst.msk [vmem:[#allocation5] sm:$0x2] %vm660_vm13, %v653_v49 }
 0x770   :  { %694 = vst.msk [vmem:[#allocation5 - $0x1] sm:$0x4] %vm665_vm14, %v658_v59  ;;  %v668_v61 = vpop.permute.xlu1 %667  ;;  %v663_v62 = vpop.permute.xlu0 %662 }
 0x771   :  { %666 = vst.msk [vmem:[#allocation5 - $0x2] sm:$0x4] %vm665_vm14, %v663_v62 }
 0x772   :  { %695 = vst.msk [vmem:[#allocation5 - $0x2] sm:$0x8] %vm670_vm15, %v663_v62  ;;  %671 = vst.msk [vmem:[#allocation5 - $0x3] sm:$0x8] %vm670_vm15, %v668_v61 }
 0x773   :  { %696 = vst.msk [vmem:[#allocation5 - $0x3] sm:$0x10] %vm675_vm1, %v668_v61 }
 0x774   :  { %v678_v7 = vpop.permute.xlu1 %677  ;;  %v673_v63 = vpop.permute.xlu0 %672 }
 0x775   :  { %676 = vst.msk [vmem:[#allocation5 - $0x4] sm:$0x10] %vm675_vm1, %v673_v63 }
 0x776   :  { %697 = vst.msk [vmem:[#allocation5 - $0x4] sm:$0x20] %vm680_vm2, %v673_v63  ;;  %681 = vst.msk [vmem:[#allocation5 - $0x5] sm:$0x20] %vm680_vm2, %v678_v7 }
 0x777   :  { %698 = vst.msk [vmem:[#allocation5 - $0x5] sm:$0x40] %vm685_vm3, %v678_v7 }
 0x778   :  { %v683_v0 = vpop.permute.xlu0 %682 }
 0x779   :  { %686 = vst.msk [vmem:[#allocation5 - $0x6] sm:$0x40] %vm685_vm3, %v683_v0 }
 0x77a   :  { %699 = vst.msk [vmem:[#allocation5 - $0x6] sm:$0x80] %vm690_vm4, %v683_v0  ;;  %691 = vst.msk [vmem:[#allocation5 - $0x7] sm:$0x80] %vm690_vm4, %v688_v60 }
 0x781   :  { %v700_v1 = vld [vmem:[#allocation5] sm:$0x3] }
 0x782   :  { %1018 = vmatmul.mubr.f32.vlgmr.msra.gmra.mrb[2].mxu1 %v700_v1 }
 0x855   :  { %v790_v8 = vpop.f32.mrb[2].mxu1 }
 0x856   :  { %v791_v9 = vadd.f32 %v901_v6, %v790_v8  ;;  %v1019_v10 = vpop.f32.mrb[3].mxu1 }
 0x858   :  { %v794_v11 = vmax.f32 %v791_v9, 0.0 }
 0x85a   :  { %1029 = vmatmul.mubr.msk.f32.vlgmr.msra.gmra.mrb[8].mxu0 %vm54_vm0, %v794_v11 }
 0x92d   :  { %v875_v13 = vpop.f32.mrb[8].mxu0 }
 0x92e   :  { %v876_v14 = vadd.f32 %v902_v12, %v875_v13  ;;  %v1030_v15 = vpop.f32.mrb[9].mxu0 }
 0x930   :  { %880 = vst.msk [vmem:[#allocation6] sm:$0x3] %vm879_vm5, %v876_v14 }
 0x931   :  { %1106 = shalt.err (!%p1103_p4)
}
 0x932   :  { %s1107_s19 = scalar_lea.hbm %s1464_s15, 32 }
 0x933   :  { %p1108_p5 = scmp.ne.s32.totalorder %s1464_s15, %s1107_s19  ;;  %p1111_p6 = scmp.lt.u32.totalorder %s1107_s19, %s1464_s15 }
 0x935   :  { %p1113_p7 = pnand %p1111_p6, %p1108_p5 }
 0x937   :  { %1116 = shalt.err (!%p1113_p7)
}
 0x938   :  { %890 = dma.vmem_to_hbm [thread:$0]  %s888_s22, 32, %s1464_s15, [#allocation7]  }
 0x939   :  { %1117 = dma.done.wait [#allocation7], 32  }
 0x93a   :  { %1118 = vsyncadd [#allocation7], 4294967264 }
 0x93b   :  { %894 = vsyncpa [#allocation7], 1 }

</bundles_post_ra>
